<compile_context>
chip_gen: v7x
topology: tpu7x:2x2x1
jax: 0.10.0
libtpu: 0.0.40
codegen_flags: <defaults>
</compile_context>

<pallas_src>
import jax
import jax.numpy as jnp
from jax.experimental import pallas as pl
from jax.experimental.pallas import tpu as pltpu

EPS = 1e-5  # BatchNorm3d default eps


def conv_bn_relu_kernel(p_ref, w_ref, shift_ref, o_ref):
    # p_ref:     (K, tile_m)     im2col patches, lane dim = output positions
    # w_ref:     (Cout, K)       BN scale pre-folded; resident across the grid
    # shift_ref: (Cout, 1)       fused conv-bias + BN shift; resident
    # o_ref:     (Cout, tile_m)  lane-dense output tile (unmasked full-lane stores)
    acc = jnp.dot(w_ref[...], p_ref[...], preferred_element_type=jnp.float32)
    # TODO(synk): pass precision=jax.lax.Precision.HIGHEST above if bit-closeness
    # to PyTorch's f32 conv is required (kernel is HBM-bound, so it would be cheap).
    o_ref[...] = jnp.maximum(acc + shift_ref[...], 0.0).astype(o_ref.dtype)
    # TODO(synk): Dropout(p=0.2) is identity in eval mode; intentionally omitted.


def _round_up(a, b):
    return ((a + b - 1) // b) * b


def _cdiv(a, b):
    return (a + b - 1) // b


def _pick_tile_m(m_per_sample, n_samples, preferred=16384):
    """Lane-dim tile over the per-sample M axis (M = D*Ho*Wo).

    - multiple of 128 (lane aligned, unmasked vst)
    - as large as possible up to `preferred` (amortizes ~0.35 us/step overhead)
    - sized from the number of tiles so tail padding stays < ~128 per tile
    - guarantees >= 2 total parallel grid steps when possible (dual-TC v7x)
    """
    lane = 128
    mn_pad = _round_up(max(m_per_sample, 1), lane)
    n_tiles = max(1, _cdiv(mn_pad, preferred))
    if n_samples * n_tiles < 2 and mn_pad >= 2 * lane:
        n_tiles = 2  # split one sample so both TensorCores get work
    tile = _round_up(_cdiv(mn_pad, n_tiles), lane)
    return tile


def conv3d_bn_relu(x, w, b, gamma, beta, mean, var, *,
                   preferred_tile_m=16384, out_dtype=jnp.float32):
    """x: (N, 1, D, H, W) f32; w: (64, 1, 1, 3, 3); returns (N, 64, D, Ho, Wo)."""
    N, Cin, D, H, W = x.shape
    assert Cin == 1, "conv3d_1 has in_channels=1"
    Cout = w.shape[0]
    kh = kw = 3
    sh = sw = 3
    ph, pw = 0, 2
    K = kh * kw

    # --- plain-JAX glue: pad + im2col built directly in (N, K, M) orientation ---
    # stride == kernel -> non-overlapping patches, so im2col is pad + reshape.
    # TODO(synk): this shortcut requires Cin==1 and stride==kernel; also verify in
    # the HLO that allow_input_fusion fuses this pad/transpose producer into the
    # kernel's input DMA (otherwise consider bf16 patches or in-kernel im2col).
    xp = jnp.pad(x, ((0, 0), (0, 0), (0, 0), (ph, ph), (pw, pw)))
    Hp, Wp = H + 2 * ph, W + 2 * pw
    Ho = (Hp - kh) // sh + 1
    Wo = (Wp - kw) // sw + 1
    Mn = D * Ho * Wo                                   # per-sample output positions
    xc = xp[:, 0, :, : Ho * sh, : Wo * sw]             # (N, D, Ho*3, Wo*3)
    patches = xc.reshape(N, D, Ho, kh, Wo, kw)
    patches = patches.transpose(0, 3, 5, 1, 2, 4)      # (N, kh, kw, D, Ho, Wo)
    patches = patches.reshape(N, K, Mn)

    # lane-aligned tiling of the per-sample M axis
    tile_m = _pick_tile_m(Mn, N, preferred_tile_m)
    Mp = _round_up(Mn, tile_m)
    if Mp != Mn:
        patches = jnp.pad(patches, ((0, 0), (0, 0), (0, Mp - Mn)))

    # fold conv bias + BN(eval): scale into the weight rows, shift per channel
    inv_std = 1.0 / jnp.sqrt(var + EPS)
    scale = gamma * inv_std                                           # (Cout,)
    wmat = w.reshape(Cout, K).astype(jnp.float32) * scale[:, None]    # (Cout, K)
    shift = ((b - mean) * scale + beta)[:, None]                      # (Cout, 1)

    # --- Pallas hot path: lane-dense tiled GEMM + fused BN/ReLU epilogue ---
    out = pl.pallas_call(
        conv_bn_relu_kernel,
        out_shape=jax.ShapeDtypeStruct((N, Cout, Mp), out_dtype),
        grid_spec=pltpu.PrefetchScalarGridSpec(
            num_scalar_prefetch=0,
            grid=(N, Mp // tile_m),
            in_specs=[
                pl.BlockSpec((None, K, tile_m), lambda n, i: (n, 0, i)),
                pl.BlockSpec((Cout, K), lambda n, i: (0, 0)),
                pl.BlockSpec((Cout, 1), lambda n, i: (0, 0)),
            ],
            out_specs=pl.BlockSpec((None, Cout, tile_m), lambda n, i: (n, 0, i)),
        ),
        compiler_params=pltpu.CompilerParams(
            dimension_semantics=("parallel", "parallel"),
            allow_input_fusion=[True, False, False],
            vmem_limit_bytes=32 * 1024 * 1024,
        ),
    )(patches, wmat, shift)

    # (N, Cout, Mp): drop lane padding only if present, then a free reshape to NCDHW.
    if Mp != Mn:
        out = out[:, :, :Mn]
    return out.reshape(N, Cout, D, Ho, Wo)


if __name__ == "__main__":
    key = jax.random.PRNGKey(0)
    ks = jax.random.split(key, 7)

    # small shapes consistent with Conv3d(1, 64, k=(1,3,3), s=(1,3,3), p=(0,0,2))
    N, D, H, W = 2, 4, 9, 8
    x = jax.random.normal(ks[0], (N, 1, D, H, W), jnp.float32)

    # deterministic parameter init (synthetic, not a checkpoint)
    w = 0.1 * jax.random.normal(ks[1], (64, 1, 1, 3, 3), jnp.float32)         # Conv3d weight
    b = 0.1 * jax.random.normal(ks[2], (64,), jnp.float32)                    # Conv3d bias
    gamma = 1.0 + 0.1 * jax.random.normal(ks[3], (64,), jnp.float32)          # BN weight
    beta = 0.1 * jax.random.normal(ks[4], (64,), jnp.float32)                 # BN bias
    mean = 0.1 * jax.random.normal(ks[5], (64,), jnp.float32)                 # BN running_mean
    var = 1.0 + 0.1 * jnp.abs(jax.random.normal(ks[6], (64,), jnp.float32))   # BN running_var

    y = conv3d_bn_relu(x, w, b, gamma, beta, mean, var)
    jax.block_until_ready(y)
    assert y.shape == (N, 64, D, 3, 4), y.shape
    assert bool(jnp.all(y >= 0.0))  # ReLU epilogue sanity check

    # pure-JAX reference (loose tolerance: MXU default precision is reduced for f32)
    conv = jax.lax.conv_general_dilated(
        x, w, window_strides=(1, 3, 3),
        padding=((0, 0), (0, 0), (2, 2)),
        dimension_numbers=("NCDHW", "OIDHW", "NCDHW"))
    conv = conv + b[None, :, None, None, None]
    bnref = gamma[None, :, None, None, None] * (conv - mean[None, :, None, None, None]) \
        / jnp.sqrt(var[None, :, None, None, None] + EPS) + beta[None, :, None, None, None]
    ref = jnp.maximum(bnref, 0.0)
    assert bool(jnp.allclose(y, ref, atol=5e-2, rtol=5e-2)), \
        float(jnp.max(jnp.abs(y - ref)))

    print("KERNEL_OK")
</pallas_src>

<mosaic_0001>
module attributes {stable_mosaic.version = 11 : i64} {
  func.func @conv_bn_relu_kernel(%arg0: i32, %arg1: i32, %arg2: memref<1x9x128xf32, #tpu.memory_space<vmem>>, %arg3: memref<64x9xf32, #tpu.memory_space<vmem>>, %arg4: memref<64x1xf32, #tpu.memory_space<vmem>>, %arg5: memref<1x64x128xf32, #tpu.memory_space<vmem>>) attributes {dimension_semantics = [#tpu.dimension_semantics<parallel>, #tpu.dimension_semantics<parallel>], iteration_bounds = array<i64: 2, 1>, scalar_prefetch = 0 : i64, scratch_operands = 0 : i64, tpu.core_type = #tpu.core_type<tc>, window_params = [{transform_indices = @transform_0, window_bounds = array<i64: 1, 9, 128>}, {pipeline_mode = #tpu.pipeline_mode<synchronous>, transform_indices = @transform_1, window_bounds = array<i64: 64, 9>}, {pipeline_mode = #tpu.pipeline_mode<synchronous>, transform_indices = @transform_2, window_bounds = array<i64: 64, 1>}, {transform_indices = @transform_3, window_bounds = array<i64: 1, 64, 128>}]} {
    %c0 = arith.constant 0 : index
    %c0_0 = arith.constant 0 : index
    %0 = vector.load %arg3[%c0, %c0_0] : memref<64x9xf32, #tpu.memory_space<vmem>>, vector<64x9xf32>
    %c0_1 = arith.constant 0 : index
    %c0_2 = arith.constant 0 : index
    %c0_3 = arith.constant 0 : index
    %1 = vector.load %arg2[%c0_1, %c0_2, %c0_3] : memref<1x9x128xf32, #tpu.memory_space<vmem>>, vector<1x9x128xf32>
    %2 = vector.shape_cast %1 : vector<1x9x128xf32> to vector<9x128xf32>
    %cst = arith.constant dense<0.000000e+00> : vector<64x128xf32>
    %3 = tpu.matmul %0, %2, %cst {dimension_numbers = #tpu.dot_dimension_numbers<[1], [0], [0], [1], [0, 0, 1, 1], [], []>} : vector<64x9xf32>, vector<9x128xf32>, vector<64x128xf32> -> vector<64x128xf32>
    %c0_4 = arith.constant 0 : index
    %c0_5 = arith.constant 0 : index
    %4 = vector.load %arg4[%c0_4, %c0_5] : memref<64x1xf32, #tpu.memory_space<vmem>>, vector<64x1xf32>
    %5 = vector.broadcast %4 : vector<64x1xf32> to vector<64x128xf32>
    %6 = arith.addf %3, %5 : vector<64x128xf32>
    %cst_6 = arith.constant 0.000000e+00 : f32
    %7 = vector.broadcast %cst_6 : f32 to vector<64x128xf32>
    %8 = arith.maximumf %6, %7 : vector<64x128xf32>
    %c0_7 = arith.constant 0 : index
    %c0_8 = arith.constant 0 : index
    %c0_9 = arith.constant 0 : index
    %9 = vector.load %arg5[%c0_7, %c0_8, %c0_9] : memref<1x64x128xf32, #tpu.memory_space<vmem>>, vector<1x64x128xf32>
    %10 = vector.shape_cast %9 : vector<1x64x128xf32> to vector<64x128xf32>
    %11 = vector.shape_cast %8 : vector<64x128xf32> to vector<1x64x128xf32>
    tpu.vector_store %arg5[%c0_7, %c0_8, %c0_9], %11 {strides = array<i32>} : memref<1x64x128xf32, #tpu.memory_space<vmem>>, vector<1x64x128xf32>,
    return
  }
  func.func @transform_0(%arg0: i32, %arg1: i32) -> (i32, i32, i32) {
    %c0_i32 = arith.constant 0 : i32
    %c0_i32_0 = arith.constant 0 : i32
    return %arg0, %c0_i32, %arg1 : i32, i32, i32
  }
  func.func @transform_1(%arg0: i32, %arg1: i32) -> (i32, i32) {
    %c0_i32 = arith.constant 0 : i32
    %c0_i32_0 = arith.constant 0 : i32
    %c0_i32_1 = arith.constant 0 : i32
    return %c0_i32, %c0_i32_0 : i32, i32
  }
  func.func @transform_2(%arg0: i32, %arg1: i32) -> (i32, i32) {
    %c0_i32 = arith.constant 0 : i32
    %c0_i32_0 = arith.constant 0 : i32
    %c0_i32_1 = arith.constant 0 : i32
    return %c0_i32, %c0_i32_0 : i32, i32
  }
  func.func @transform_3(%arg0: i32, %arg1: i32) -> (i32, i32, i32) {
    %c0_i32 = arith.constant 0 : i32
    %c0_i32_0 = arith.constant 0 : i32
    return %arg0, %c0_i32, %arg1 : i32, i32, i32
  }
}

</mosaic_0001>

<bundles_post_ra>
// kernel: tpu_custom_call.1
= control target key start
LH: loop header
LB: loop body
LE: loop exit
PB: predicated region body
PF: predicated region fallthrough
CT: control target
= control target key end

     0   :  { %8 = vsyncpa [#allocation3], 0  ;;  %s894_s0 = inlined_call_operand.vmem [shape: f32[2,9,128], index: 0, kind: input, shape index: {}]   ;;  %s895_s1 = inlined_call_operand.vmem [shape: f32[64,9], index: 1, kind: input, shape index: {}]   ;;  %s896_s2 = inlined_call_operand.vmem [shape: f32[64,1], index: 2, kind: input, shape index: {}]   ;;  %s897_s3 = inlined_call_operand.hbm [shape: f32[2,64,128], index: 3, kind: output, shape index: {}]  }
   0x1   :  { %10 = vsyncpa [#allocation3 + $0x1], 0  ;;  %s719_s12 = smov 0   ;;  %s721_s13 = smov 0  }
   0x2   :  { %s723_s14 = smov 0   ;;  %s725_s15 = smov 0  }
   0x3   :  { %s727_s16 = smov 0   ;;  %s729_s17 = smov 0  }
   0x4 LB: > { %s495_s18 = sadd.s32 4294967295, %s692_s17   ;;  %s496_s19 = sadd.s32 4294967294, %s692_s17   ;;  %s692_s17 = sphi %s729_s17, %s16_s17   ;;  %s688_s16 = sphi %s727_s16, %s904_s16   ;;  %s684_s15 = sphi %s725_s15, %s903_s15   ;;  %s680_s14 = sphi %s723_s14, %s902_s14   ;;  %s676_s13 = sphi %s721_s13, %s901_s13   ;;  %s672_s12 = sphi %s719_s12, %s900_s12  }
   0x5   : > { %s28_s20 = sadd.s32 1, %s688_s16  ;;  %s107_s21 = sadd.s32 1, %s680_s14 }
   0x6   : > { %p30_p0 = scmp.ge.s32.totalorder %s28_s20, 2  ;;  %p117_p1 = scmp.ne.s32.totalorder %s680_s14, %s676_s13 }
   0x7   : > { %p118_p2 = scmp.eq.s32.totalorder %s495_s18, 1  ;;  %p123_p3 = scmp.ne.s32.totalorder %s676_s13, %s672_s12 }
   0x8   : > { %s906_s20 = smov (%p30_p0, %s28_s20), 0  ;;  %p124_p5 = scmp.eq.s32.totalorder %s496_s19, 1 }
   0x9   : > { %p759_p4 = por %p118_p2, %p117_p1  ;;  %s102_s23 = ssub.s32 %s688_s16, %s906_s20 }
   0xa   : > { %p499_p6 = scmp.ge.s32.totalorder %s692_s17, 1  ;;  %p105_p7 = scmp.eq.s32.totalorder %s102_s23, 0 }
   0xb   : > { %p766_p8 = por %p124_p5, %p123_p3  ;;  %p159_p9 = scmp.lt.s32.totalorder %s692_s17, 3 }
   0xc   : > { %s772_s25 = scalar_select %p105_p7, %s680_s14, %s107_s21  }
   0xd   : > { %p160_p10 = pnand %p499_p6, %p159_p9 }
   0xe   : > { %p186_p11 = scmp.lt.s32.totalorder (!%p160_p10), %s684_s15, 1  ;;  %v194_v0 = vld [vmem:[%s895_s1] sm:$0xff] (!%p160_p10)  ;;  %vm252_vm0 = vcmask (!%p160_p10), 72704   ;;  %v694_v2 = vmov (!%p160_p10), 0   ;;  %vm277_vm1 = vcmask (!%p160_p10), 1040384   ;;  %v206_v3 = vld [vmem:[%s896_s2 + $0x10] sm:$0xff] (!%p160_p10) }
   0xf   : > { %163 = sbr.rel (%p160_p10) target bundleno = 269 (0x10d), region = 32  ;;  %v198_v1 = vld [vmem:[%s895_s1 + $0x20] sm:$0xff] (!%p160_p10)  ;;  %533 = vmatprep.mubr.msk.f32.mxu0 (!%p160_p10), %vm252_vm0, %v194_v0  ;;  %613 = vset.pattern.permute.xlu1 (!%p160_p10), %v694_v2  ;;  %v207_v5 = vld [vmem:[%s896_s2 + $0x18] sm:$0xff] (!%p160_p10)  ;;  %v205_v6 = vld [vmem:[%s896_s2 + $0x8] sm:$0xff] (!%p160_p10)  ;;  %vm695_vm2 = vmmov (!%p160_p10), 1   ;;  %s183_s29 = sand.u32 (!%p160_p10), 1, %s676_s13  }
  0x10   : > { %539 = vmatprep.mubr.msk.f32.mxu1 (!%p160_p10), %vm252_vm0, %v198_v1  ;;  %612 = vset.pattern.permute.xlu0 (!%p160_p10), %v694_v2  ;;  %v204_v4 = vld [vmem:[%s896_s2] sm:$0xff] (!%p160_p10)  ;;  %vm546_vm3 = vmpackc.low (!%p160_p10), %vm277_vm1, %vm695_vm2  ;;  %v209_v10 = vld [vmem:[%s896_s2 + $0x28] sm:$0xff] (!%p160_p10)  ;;  %s518_s4 = sshll.u32 (!%p160_p10), %s684_s15, 10  ;;  %s848_s9 = scalar_lea.sflag (!%p160_p10), [#allocation3], %s183_s29 }
  0x11   : > { %224 = vperm.xlu1 (!%p160_p10), %613, %v206_v3   ;;  %214 = vperm.xlu0 (!%p160_p10), %612, %v204_v4   ;;  %v208_v11 = vld [vmem:[%s896_s2 + $0x20] sm:$0xff] (!%p160_p10)  ;;  %v195_v12 = vld [vmem:[%s895_s1 + $0x8] sm:$0xff] (!%p160_p10)  ;;  %v196_v14 = vld [vmem:[%s895_s1 + $0x10] sm:$0xff] (!%p160_p10) }
  0x12   : > { %v199_v13 = vld [vmem:[%s895_s1 + $0x28] sm:$0xff] (!%p160_p10)  ;;  %v200_v15 = vld [vmem:[%s895_s1 + $0x30] sm:$0xff] (!%p160_p10)  ;;  %v211_v16 = vld [vmem:[%s896_s2 + $0x38] sm:$0xff] (!%p160_p10) }
  0x13   : > { %v210_v17 = vld [vmem:[%s896_s2 + $0x30] sm:$0xff] (!%p160_p10)  ;;  %v197_v18 = vld [vmem:[%s895_s1 + $0x18] sm:$0xff] (!%p160_p10) }
  0x14   : > { %v201_v19 = vld [vmem:[%s895_s1 + $0x38] sm:$0xff] (!%p160_p10) }
  0x15   : > { %229 = vperm.xlu1 (!%p160_p10), %613, %v207_v5   ;;  %219 = vperm.xlu0 (!%p160_p10), %612, %v205_v6  }
  0x16   : > { %s187_s30 = scalar_select %p186_p11, %s684_s15, 1 }
  0x17   : > { %s842_s15 = scalar_lea.hbm %s897_s3, %s518_s4 }
  0x18   : > { %s517_s8 = sshll.u32 %s187_s30, 4  ;;  %s500_s30 = sshll.u32 %s183_s29, 6 }
  0x19   : > { %s193_s11 = scalar_lea.vmem %s894_s0, %s517_s8  ;;  %239 = vperm.xlu1 %613, %v209_v10   ;;  %234 = vperm.xlu0 %612, %v208_v11   ;;  %s185_s5 = scalar_lea.vmem [#allocation2], %s500_s30 }
  0x1a   : > { %v202_v7 = vld [vmem:[%s193_s11] sm:$0xff]  ;;  %v203_v8 = vld [vmem:[%s193_s11 + $0x8] sm:$0x1]  ;;  %s417_s6 = sshll.u32 %s185_s5, 4  ;;  %s696_s11 = smov [#allocation2]   ;;  %s844_s6 = int_to_ptr.vmem [resolvable:$true] %s417_s6 }
  0x1b   : > { %v545_v9 = vpack.c.bf16 %v203_v8, %v202_v7  ;;  %s614_s10 = scalar_lea.vmem %s844_s6, 1024  ;;  %s618_s18 = sshll.u32 %s696_s11, 4  ;;  %s619_s18 = int_to_ptr.vmem [resolvable:$false] %s618_s18 }
  0x1c   : > { %p615_p12 = scmp.ne.s32.totalorder %s844_s6, %s614_s10  ;;  %s620_s19 = scalar_lea.vmem %s619_s18, 2048 }
  0x1d   : > { %547 = vmatprep.subr.msk.bf16.mxu0 %vm546_vm3, %v545_v9  ;;  %551 = vmatprep.subr.msk.bf16.mxu1 %vm546_vm3, %v545_v9  ;;  %p621_p1 = scmp.lt.s32.totalorder %s844_s6, %s619_s18  ;;  %p622_p2 = scmp.lt.s32.totalorder %s620_s19, %s614_s10 }
  0x1e   : > { %550 = vmatpush3.bf16.msk.msra.mxu0 %vm546_vm3, %v545_v9  ;;  %552 = vmatpush3.bf16.msk.msra.mxu1 %vm546_vm3, %v545_v9  ;;  %p616_p13 = pnand %p615_p12, %p759_p4 }
  0x1f   : > { %249 = vperm.xlu1 %613, %v211_v16   ;;  %244 = vperm.xlu0 %612, %v210_v17   ;;  %p623_p3 = por %p622_p2, %p621_p1 }
  0x20   : > { %p617_p0 = pneg %p616_p13 }
  0x21   : > { %534 = vmatmul.mubr.msk.f32.vlgmr.msra.gmra.mrb[0].mxu0 %vm252_vm0, %v195_v12  ;;  %540 = vmatmul.mubr.msk.f32.vlgmr.msra.gmra.mrb[0].mxu1 %vm252_vm0, %v199_v13 }
  0x22   : > { %536 = vmatprep.mubr.msk.f32.mxu0 %vm252_vm0, %v196_v14  ;;  %542 = vmatprep.mubr.msk.f32.mxu1 %vm252_vm0, %v200_v15  ;;  %p624_p5 = pnand %p623_p3, %p617_p0 }
  0x25   : > { %537 = vmatmul.mubr.msk.f32.gmra.mrb[2].mxu0 %vm252_vm0, %v197_v18  ;;  %543 = vmatmul.mubr.msk.f32.gmra.mrb[2].mxu1 %vm252_vm0, %v201_v19 }
  0x90   : > { %v225_v20 = vpop.permute.xlu1 %224  ;;  %v215_v21 = vpop.permute.xlu0 %214 }
  0x94   : > { %v230_v22 = vpop.permute.xlu1 %229  ;;  %v220_v23 = vpop.permute.xlu0 %219 }
  0x98   : > { %v240_v24 = vpop.permute.xlu1 %239  ;;  %v235_v25 = vpop.permute.xlu0 %234 }
  0x9e   : > { %v250_v34 = vpop.permute.xlu1 %249  ;;  %v245_v35 = vpop.permute.xlu0 %244 }
  0xf4   : > { %v535_v26 = vpop.f32.mrb[0].mxu0  ;;  %v541_v27 = vpop.f32.mrb[0].mxu1 }
  0xf5   : > { %v353_v28 = vadd.f32 %v535_v26, %v220_v23  ;;  %v373_v29 = vadd.f32 %v541_v27, %v240_v24  ;;  %v347_v30 = vpop.f32.mrb[1].mxu0  ;;  %v367_v31 = vpop.f32.mrb[1].mxu1 }
  0xf6   : > { %v348_v32 = vadd.f32 %v347_v30, %v215_v21  ;;  %v368_v33 = vadd.f32 %v367_v31, %v235_v25 }
  0xf7   : > { %v387_v36 = vmax.f32 %v353_v28, 0.0  ;;  %v391_v37 = vmax.f32 %v373_v29, 0.0 }
  0xf8   : > { %v386_v38 = vmax.f32 %v348_v32, 0.0  ;;  %v390_v39 = vmax.f32 %v368_v33, 0.0  ;;  %v538_v40 = vpop.f32.mrb[2].mxu0  ;;  %v544_v41 = vpop.f32.mrb[2].mxu1 }
  0xf9   : > { %395 = vst [vmem:[%s185_s5 + $0x8] sm:$0xff] %v387_v36  ;;  %399 = vst [vmem:[%s185_s5 + $0x28] sm:$0xff] %v391_v37  ;;  %v363_v42 = vadd.f32 %v538_v40, %v230_v22  ;;  %v383_v43 = vadd.f32 %v544_v41, %v250_v34  ;;  %v357_v44 = vpop.f32.mrb[3].mxu0  ;;  %v377_v45 = vpop.f32.mrb[3].mxu1 }
  0xfa   : > { %394 = vst [vmem:[%s185_s5] sm:$0xff] %v386_v38  ;;  %398 = vst [vmem:[%s185_s5 + $0x20] sm:$0xff] %v390_v39  ;;  %v358_v46 = vadd.f32 %v357_v44, %v225_v20  ;;  %v378_v47 = vadd.f32 %v377_v45, %v245_v35 }
  0xfb   : > { %v389_v48 = vmax.f32 %v363_v42, 0.0  ;;  %v393_v49 = vmax.f32 %v383_v43, 0.0 }
  0xfc   : > { %v388_v50 = vmax.f32 %v358_v46, 0.0  ;;  %v392_v51 = vmax.f32 %v378_v47, 0.0 }
  0xfd   : > { %397 = vst [vmem:[%s185_s5 + $0x18] sm:$0xff] %v389_v48  ;;  %401 = vst [vmem:[%s185_s5 + $0x38] sm:$0xff] %v393_v49 }
  0xfe   : > { %396 = vst [vmem:[%s185_s5 + $0x10] sm:$0xff] %v388_v50  ;;  %400 = vst [vmem:[%s185_s5 + $0x30] sm:$0xff] %v392_v51 }
  0xff   : > { %627 = shalt.err (!%p624_p5)
}
 0x100   : > { %s628_s21 = scalar_lea.hbm %s842_s15, 1024  ;;  %s632_s27 = scalar_lea.hbm %s897_s3, 2048 }
 0x101   : > { %p629_p6 = scmp.ne.s32.totalorder %s842_s15, %s628_s21  ;;  %p633_p10 = scmp.lt.u32.totalorder %s842_s15, %s897_s3 }
 0x102   : > { %p634_p11 = scmp.lt.u32.totalorder %s632_s27, %s628_s21  ;;  %p636_p13 = scmp.lt.u32.totalorder %s628_s21, %s842_s15 }
 0x103   : > { %p630_p7 = pnand %p629_p6, %p759_p4 }
 0x104   : > { %p635_p12 = por %p634_p11, %p633_p10 }
 0x105   : > { %p631_p9 = pneg %p630_p7 }
 0x106   : > { %p637_p0 = por %p636_p13, %p635_p12 }
 0x108   : > { %p638_p1 = pnand %p637_p0, %p631_p9 }
 0x10a   : > { %641 = shalt.err (!%p638_p1)
}
 0x10b   : > { %s697_s30 = smov 128   ;;  %s698_s4 = smov 8  }
 0x10c   : > { %553 = dma.vmem_to_hbm [thread:$0]  (%p759_p4), %s844_s6, 1024, %s842_s15, %s848_s9, %s697_s30, %s697_s30, %s698_s4  }
 0x10d PF: > { %p559_p2 = scmp.ge.s32.totalorder %s692_s17, 2  ;;  %s432_s5 = sand.u32 1, %s672_s12  }
 0x10e   : > { %s433_s7 = scalar_lea.sflag [#allocation3], %s432_s5 }
 0x10f   : > { %p556_p3 = pnand %p559_p2, %p766_p8 }
 0x111   : > { %667 = dma.done.wait (!%p556_p3), %s433_s7, 1024  }
 0x112   : > { %669 = vsyncadd (!%p556_p3), %s433_s7, 4294966272  ;;  %s16_s17 = sadd.s32 1, %s692_s17   ;;  %s900_s12 = smov %s676_s13 }
 0x113   : > { %p13_p5 = scmp.ge.s32.totalorder %s16_s17, 4   ;;  %s901_s13 = smov %s680_s14 }
 0x114   : > { %s902_s14 = smov %s772_s25  ;;  %s903_s15 = smov %s688_s16 }
 0x115   : > { %s904_s16 = smov %s906_s20  ;;  %15 = sbr.rel (!%p13_p5) target bundleno = 4 (0x4), region = 67 }
 0x11c   :  { %438 = vsyncpa [#allocation3], 1 }
 0x11d   :  { %440 = vsyncpa [#allocation3 + $0x1], 1 }

</bundles_post_ra>
